<compile_context>
chip_gen: v5e
topology: v5e:2x2
jax: 0.10.0
libtpu: 0.0.40
codegen_flags: <defaults>
</compile_context>

<pallas_src>
import jax
import jax.numpy as jnp
from jax.experimental import pallas as pl
from jax.experimental.pallas import tpu as pltpu


def conv1d_relu_kernel(x_ref, w_ref, b_ref, o_ref):
    # x_ref: (C_in, L + 2*pad)  zero-padded input, one batch element
    # w_ref: (K, C_out, C_in)   tap-major weight
    # b_ref: (C_out, 1)
    # o_ref: (C_out, L_out)     L_out is a multiple of 128 in the demo
    K = w_ref.shape[0]
    L_out = o_ref.shape[-1]

    xp = x_ref[...]                                   # load once: (C_in, Lp)
    acc = jnp.zeros(o_ref.shape, jnp.float32)
    for k in range(K):                                # K small & static -> unrolled
        x_k = xp[:, k:k + L_out]                      # (C_in, L_out) shifted window
        acc += jnp.dot(w_ref[k], x_k,                 # (C_out,C_in)@(C_in,L) on MXU
                       preferred_element_type=jnp.float32)
    acc += b_ref[...]                                 # broadcast (C_out,1) over lanes
    o_ref[...] = jnp.maximum(acc, 0.0).astype(o_ref.dtype)


def conv1d_relu(x, weight, bias, *, padding, stride=1):
    """relu(conv1d(x, weight, bias, stride=1, padding)) matching Conv1dReLU."""
    if stride != 1:
        # TODO(synk): strided conv support; the module's listed variants are all stride=1.
        raise NotImplementedError("stride != 1 not implemented")

    B, C_in, L = x.shape
    C_out, C_in_w, K = weight.shape
    assert C_in_w == C_in
    Lp = L + 2 * padding
    L_out = Lp - K + 1

    x_p = jnp.pad(x, ((0, 0), (0, 0), (padding, padding)))  # Conv1d zero padding
    w_t = jnp.transpose(weight, (2, 0, 1))                   # (K, C_out, C_in); tiny, ideally done offline
    b2d = bias.reshape(C_out, 1)

    flops = 2 * B * C_out * C_in * K * L_out
    bytes_accessed = 4 * (x_p.size + w_t.size + b2d.size + B * C_out * L_out)

    return pl.pallas_call(
        conv1d_relu_kernel,
        out_shape=jax.ShapeDtypeStruct((B, C_out, L_out), x.dtype),
        grid=(B,),
        in_specs=[
            pl.BlockSpec((None, C_in, Lp), lambda b: (b, 0, 0)),     # one batch elem / step
            pl.BlockSpec((K, C_out, C_in), lambda b: (0, 0, 0)),     # whole weight, constant block
            pl.BlockSpec((C_out, 1), lambda b: (0, 0)),              # bias, constant block
        ],
        out_specs=pl.BlockSpec((None, C_out, L_out), lambda b: (b, 0, 0)),
        compiler_params=pltpu.CompilerParams(
            dimension_semantics=("parallel",)),
        cost_estimate=pl.CostEstimate(
            flops=flops, transcendentals=0, bytes_accessed=bytes_accessed),
    )(x_p, w_t, b2d)


if __name__ == "__main__":
    # Small shapes consistent with the module: batch=4, in=8, out=16, k=3, p=1.
    # Sequence length 128 so the kernel's output last dim is lane-dense.
    B, C_in, C_out, K, pad = 4, 8, 16, 3, 1
    L = 128

    key = jax.random.PRNGKey(0)
    kx, kw, kb = jax.random.split(key, 3)

    # PyTorch Conv1d default init: uniform(-1/sqrt(C_in*K), 1/sqrt(C_in*K)).
    bound = 1.0 / jnp.sqrt(jnp.float32(C_in * K))
    weight = jax.random.uniform(kw, (C_out, C_in, K), jnp.float32, -bound, bound)
    bias = jax.random.uniform(kb, (C_out,), jnp.float32, -bound, bound)
    x = jax.random.normal(kx, (B, C_in, L), jnp.float32)

    out = conv1d_relu(x, weight, bias, padding=pad)
    jax.block_until_ready(out)

    # Pure-JAX reference: XLA conv1d (NCH layout) + bias + ReLU, full precision.
    ref = jax.lax.conv_general_dilated(
        x, weight, window_strides=(1,), padding=[(pad, pad)],
        dimension_numbers=("NCH", "OIH", "NCH"),
        precision=jax.lax.Precision.HIGHEST)
    ref = jnp.maximum(ref + bias[None, :, None], 0.0)

    assert out.shape == (B, C_out, L)
    max_err = float(jnp.max(jnp.abs(out - ref)))
    assert jnp.allclose(out, ref, atol=2e-3, rtol=2e-3), max_err

    print("KERNEL_OK")
</pallas_src>

<mosaic_0001>
module attributes {stable_mosaic.version = 11 : i64} {
  func.func @conv1d_relu_kernel(%arg0: i32, %arg1: memref<1x8x130xf32, #tpu.memory_space<vmem>>, %arg2: memref<3x16x8xf32, #tpu.memory_space<vmem>>, %arg3: memref<16x1xf32, #tpu.memory_space<vmem>>, %arg4: memref<1x16x128xf32, #tpu.memory_space<vmem>>) attributes {dimension_semantics = [#tpu.dimension_semantics<parallel>], iteration_bounds = array<i64: 4>, scalar_prefetch = 0 : i64, scratch_operands = 0 : i64, tpu.core_type = #tpu.core_type<tc>, window_params = [{transform_indices = @transform_0, window_bounds = array<i64: 1, 8, 130>}, {pipeline_mode = #tpu.pipeline_mode<synchronous>, transform_indices = @transform_1, window_bounds = array<i64: 3, 16, 8>}, {pipeline_mode = #tpu.pipeline_mode<synchronous>, transform_indices = @transform_2, window_bounds = array<i64: 16, 1>}, {transform_indices = @transform_3, window_bounds = array<i64: 1, 16, 128>}]} {
    %c0 = arith.constant 0 : index
    %c0_0 = arith.constant 0 : index
    %c0_1 = arith.constant 0 : index
    %0 = vector.load %arg1[%c0, %c0_0, %c0_1] : memref<1x8x130xf32, #tpu.memory_space<vmem>>, vector<1x8x130xf32>
    %1 = vector.shape_cast %0 : vector<1x8x130xf32> to vector<8x130xf32>
    %cst = arith.constant 0.000000e+00 : f32
    %2 = vector.broadcast %cst : f32 to vector<16x128xf32>
    %3 = vector.extract_strided_slice %1 {offsets = [0, 0], sizes = [8, 128], strides = [1, 1]} : vector<8x130xf32> to vector<8x128xf32>
    %c0_2 = arith.constant 0 : index
    %c0_3 = arith.constant 0 : index
    %c0_4 = arith.constant 0 : index
    %4 = vector.load %arg2[%c0_2, %c0_3, %c0_4] : memref<3x16x8xf32, #tpu.memory_space<vmem>>, vector<1x16x8xf32>
    %5 = vector.shape_cast %4 : vector<1x16x8xf32> to vector<16x8xf32>
    %cst_5 = arith.constant dense<0.000000e+00> : vector<16x128xf32>
    %6 = tpu.matmul %5, %3, %cst_5 {dimension_numbers = #tpu.dot_dimension_numbers<[1], [0], [0], [1], [0, 0, 1, 1], [], []>} : vector<16x8xf32>, vector<8x128xf32>, vector<16x128xf32> -> vector<16x128xf32>
    %7 = arith.addf %2, %6 : vector<16x128xf32>
    %8 = vector.extract_strided_slice %1 {offsets = [0, 1], sizes = [8, 128], strides = [1, 1]} : vector<8x130xf32> to vector<8x128xf32>
    %c1 = arith.constant 1 : index
    %c0_6 = arith.constant 0 : index
    %c0_7 = arith.constant 0 : index
    %9 = vector.load %arg2[%c1, %c0_6, %c0_7] : memref<3x16x8xf32, #tpu.memory_space<vmem>>, vector<1x16x8xf32>
    %10 = vector.shape_cast %9 : vector<1x16x8xf32> to vector<16x8xf32>
    %cst_8 = arith.constant dense<0.000000e+00> : vector<16x128xf32>
    %11 = tpu.matmul %10, %8, %cst_8 {dimension_numbers = #tpu.dot_dimension_numbers<[1], [0], [0], [1], [0, 0, 1, 1], [], []>} : vector<16x8xf32>, vector<8x128xf32>, vector<16x128xf32> -> vector<16x128xf32>
    %12 = arith.addf %7, %11 : vector<16x128xf32>
    %13 = vector.extract_strided_slice %1 {offsets = [0, 2], sizes = [8, 128], strides = [1, 1]} : vector<8x130xf32> to vector<8x128xf32>
    %c2 = arith.constant 2 : index
    %c0_9 = arith.constant 0 : index
    %c0_10 = arith.constant 0 : index
    %14 = vector.load %arg2[%c2, %c0_9, %c0_10] : memref<3x16x8xf32, #tpu.memory_space<vmem>>, vector<1x16x8xf32>
    %15 = vector.shape_cast %14 : vector<1x16x8xf32> to vector<16x8xf32>
    %cst_11 = arith.constant dense<0.000000e+00> : vector<16x128xf32>
    %16 = tpu.matmul %15, %13, %cst_11 {dimension_numbers = #tpu.dot_dimension_numbers<[1], [0], [0], [1], [0, 0, 1, 1], [], []>} : vector<16x8xf32>, vector<8x128xf32>, vector<16x128xf32> -> vector<16x128xf32>
    %17 = arith.addf %12, %16 : vector<16x128xf32>
    %c0_12 = arith.constant 0 : index
    %c0_13 = arith.constant 0 : index
    %18 = vector.load %arg3[%c0_12, %c0_13] : memref<16x1xf32, #tpu.memory_space<vmem>>, vector<16x1xf32>
    %19 = vector.broadcast %18 : vector<16x1xf32> to vector<16x128xf32>
    %20 = arith.addf %17, %19 : vector<16x128xf32>
    %cst_14 = arith.constant 0.000000e+00 : f32
    %21 = vector.broadcast %cst_14 : f32 to vector<16x128xf32>
    %22 = arith.maximumf %20, %21 : vector<16x128xf32>
    %c0_15 = arith.constant 0 : index
    %c0_16 = arith.constant 0 : index
    %c0_17 = arith.constant 0 : index
    %23 = vector.load %arg4[%c0_15, %c0_16, %c0_17] : memref<1x16x128xf32, #tpu.memory_space<vmem>>, vector<1x16x128xf32>
    %24 = vector.shape_cast %23 : vector<1x16x128xf32> to vector<16x128xf32>
    %25 = vector.shape_cast %22 : vector<16x128xf32> to vector<1x16x128xf32>
    tpu.vector_store %arg4[%c0_15, %c0_16, %c0_17], %25 {strides = array<i32>} : memref<1x16x128xf32, #tpu.memory_space<vmem>>, vector<1x16x128xf32>,
    return
  }
  func.func @transform_0(%arg0: i32) -> (i32, i32, i32) {
    %c0_i32 = arith.constant 0 : i32
    %c0_i32_0 = arith.constant 0 : i32
    %c0_i32_1 = arith.constant 0 : i32
    return %arg0, %c0_i32, %c0_i32_0 : i32, i32, i32
  }
  func.func @transform_1(%arg0: i32) -> (i32, i32, i32) {
    %c0_i32 = arith.constant 0 : i32
    %c0_i32_0 = arith.constant 0 : i32
    %c0_i32_1 = arith.constant 0 : i32
    %c0_i32_2 = arith.constant 0 : i32
    return %c0_i32, %c0_i32_0, %c0_i32_1 : i32, i32, i32
  }
  func.func @transform_2(%arg0: i32) -> (i32, i32) {
    %c0_i32 = arith.constant 0 : i32
    %c0_i32_0 = arith.constant 0 : i32
    %c0_i32_1 = arith.constant 0 : i32
    return %c0_i32, %c0_i32_0 : i32, i32
  }
  func.func @transform_3(%arg0: i32) -> (i32, i32, i32) {
    %c0_i32 = arith.constant 0 : i32
    %c0_i32_0 = arith.constant 0 : i32
    %c0_i32_1 = arith.constant 0 : i32
    return %arg0, %c0_i32, %c0_i32_0 : i32, i32, i32
  }
}

</mosaic_0001>

<bundles_post_ra>
// kernel: tpu_custom_call.1
= control target key start
LH: loop header
LB: loop body
LE: loop exit
PB: predicated region body
PF: predicated region fallthrough
CT: control target
= control target key end

     0   :  { %8 = vsyncpa [#allocation3], 0  ;;  %s666_s0 = inlined_call_operand.vmem [shape: f32[4,8,130], index: 0, kind: input, shape index: {}]   ;;  %s667_s1 = inlined_call_operand.vmem [shape: f32[3,16,8], index: 1, kind: input, shape index: {}]   ;;  %s668_s2 = inlined_call_operand.vmem [shape: f32[16,1], index: 2, kind: input, shape index: {}]   ;;  %s669_s3 = inlined_call_operand.hbm [shape: f32[4,16,128], index: 3, kind: output, shape index: {}]  }
   0x1   :  { %10 = vsyncpa [#allocation3 + $0x1], 0  ;;  %s551_s12 = smov 0   ;;  %s553_s13 = smov 0  }
   0x2   :  { %s555_s14 = smov 0   ;;  %s557_s15 = smov 0  }
   0x3 LB: > { %s572_s16 = sadd.s32 4294967295, %s524_s15   ;;  %s381_s17 = sadd.s32 4294967294, %s524_s15   ;;  %s524_s15 = sphi %s557_s15, %s675_s15   ;;  %s520_s14 = sphi %s555_s14, %s674_s14   ;;  %s516_s13 = sphi %s553_s13, %s673_s13   ;;  %s512_s12 = sphi %s551_s12, %s672_s12  }
   0x4   : > { %s576_s18 = sadd.s32 1, %s524_s15   ;;  %s91_s19 = sadd.s32 1, %s520_s14 }
   0x5   : > { %s88_s20 = ssub.s32 %s524_s15, %s576_s18  ;;  %p101_p0 = scmp.ne.s32.totalorder %s520_s14, %s516_s13 }
   0x6   : > { %p89_p1 = scmp.eq.s32.totalorder %s88_s20, 0  ;;  %p102_p2 = scmp.eq.s32.totalorder %s572_s16, 3 }
   0x7   : > { %p107_p3 = scmp.ne.s32.totalorder %s516_s13, %s512_s12  ;;  %p108_p4 = scmp.eq.s32.totalorder %s381_s17, 3 }
   0x8   : > { %s587_s21 = scalar_select %p89_p1, %s520_s14, %s91_s19  }
   0x9   : > { %p589_p5 = por %p102_p2, %p101_p0  ;;  %p593_p6 = por %p108_p4, %p107_p3 }
   0xa   : > { %p384_p7 = scmp.ge.s32.totalorder %s524_s15, 1  ;;  %p140_p8 = scmp.lt.s32.totalorder %s524_s15, 5 }
   0xc   : > { %p141_p9 = pnand %p384_p7, %p140_p8 }
   0xd   : > { %p164_p10 = scmp.lt.s32.totalorder (!%p141_p9), %s572_s16, 3  ;;  %s526_s29 = smov (!%p141_p9), 126  }
   0xe   : > { %144 = sbr.rel (%p141_p9) target bundleno = 297 (0x129), region = 32  ;;  %s527_s30 = smov (!%p141_p9), 127  }
   0xf   : > { %s404_s4 = sshll.u32 (!%p141_p9), %s572_s16, 4 }
  0x10   : > { %s315_s7 = scalar_lea.hbm (!%p141_p9), %s669_s3, %s404_s4 }
  0x11   : > { %s318_s10 = sshll.u32 (!%p141_p9), %s315_s7, 4  ;;  %s319_s10 = int_to_ptr.hbm [resolvable:$true] %s318_s10 }
  0x12   : > { %s476_s11 = sshra.s32 (!%p141_p9), %s319_s10, 4  ;;  %s477_s11 = int_to_ptr.hbm [resolvable:$true] %s476_s11 }
  0x13   : > { %s165_s24 = scalar_select %p164_p10, %s572_s16, 3  ;;  %vm185_vm0 = vcmask 64512   ;;  %v171_v3 = vld [vmem:[%s667_s1] sm:$0xff]  ;;  %v528_v5 = vmov 0   ;;  %v172_v6 = vld [vmem:[%s667_s1 + $0x8] sm:$0xff]  ;;  %vm251_vm1 = vcmask 1031168  }
  0x14   : > { %v285_v4 = vld [vmem:[%s668_s2] sm:$0xff]  ;;  %460 = vset.pattern.permute.xlu1 %v528_v5  ;;  %461 = vset.pattern.permute.xlu0 %v528_v5  ;;  %v286_v7 = vld [vmem:[%s668_s2 + $0x8] sm:$0xff]  ;;  %vm182_vm2 = vcmask 1039360   ;;  %v388_v16 = vld [vmem:[%s667_s1 + $0x10] sm:$0xff]  ;;  %s478_s17 = scalar_lea.hbm %s477_s11, 16  ;;  %p483_p0 = scmp.lt.s32.totalorder %s477_s11, %s669_s3 }
  0x15   : > { %s403_s25 = sshll.u32 %s165_s24, 4  ;;  %289 = vperm.xlu1 %460, %v285_v4   ;;  %v394_v11 = vld [vmem:[%s667_s1 + $0x20] sm:$0xff]  ;;  %v389_v17 = vld [vmem:[%s667_s1 + $0x18] sm:$0xff]  ;;  %v395_v19 = vld [vmem:[%s667_s1 + $0x28] sm:$0xff]  ;;  %p479_p11 = scmp.ne.s32.totalorder %s477_s11, %s478_s17 }
  0x16   : > { %s168_s28 = scalar_lea.vmem %s666_s0, %s403_s25  ;;  %s482_s24 = scalar_lea.hbm %s669_s3, 64 }
  0x17   : > { %v169_v0 = vld [vmem:[%s168_s28] sm:$0xff]  ;;  %v170_v1 = vld [vmem:[%s168_s28 + $0x8] sm:$0xff]  ;;  %p480_p12 = pnand %p479_p11, %p589_p5  ;;  %p484_p1 = scmp.lt.s32.totalorder %s482_s24, %s478_s17 }
  0x18   : > { %v450_v2 = vpack.i.bf16 %v170_v1, %v169_v0  ;;  %236 = vmatpush.msra.mxu1 %v169_v0 }
  0x19   : > { %392 = vmatmul.msk.f32.vlgmr.msra.gmra.mxu1 %vm185_vm0, %v171_v3  ;;  %p481_p13 = pneg %p480_p12  ;;  %p485_p2 = por %p484_p1, %p483_p0 }
  0x1a   : > { %451 = vrot.lane.b32.xlu0 %v450_v2, %s526_s29  ;;  %s161_s29 = sand.u32 1, %s516_s13  }
  0x1b   : > { %s304_s16 = scalar_lea.sflag [#allocation3], %s161_s29  ;;  %p486_p3 = pnand %p485_p2, %p481_p13 }
  0x1d   : > { %294 = vperm.xlu1 %460, %v286_v7  }
  0x21   : > { %393 = vmatmul.msk.f32.gmra.mxu1 %vm185_vm0, %v172_v6 }
  0x22   : > { %456 = vrot.lane.b32.xlu0 %v450_v2, %s527_s30  ;;  %s385_s30 = sshll.u32 %s161_s29, 4 }
  0x23   : > { %s163_s8 = scalar_lea.vmem [#allocation2], %s385_s30 }
  0x24   : > { %s316_s9 = sshll.u32 %s163_s8, 4  ;;  %s317_s9 = int_to_ptr.vmem [resolvable:$true] %s316_s9 }
  0x87   : > { %v290_v22 = vpop.permute.xlu1 %289 }
  0x8c   : > { %v452_v8 = vpop.permute.xlu0 %451 }
  0x8d   : > { %v454_v9 = vunpack.i.h.bf16 %v452_v8  ;;  %v453_v10 = vunpack.i.l.bf16 %v452_v8 }
  0x8f   : > { %v252_v12 = vsel %vm251_vm1, %v453_v10, %v454_v9  ;;  %v295_v33 = vpop.permute.xlu1 %294 }
  0x90   : > { %275 = vmatpush.msra.mxu2 %v252_v12 }
  0x91   : > { %396 = vmatmul.msk.f32.vlgmr.msra.gmra.mxu2 %vm185_vm0, %v394_v11 }
  0x94   : > { %v457_v13 = vpop.permute.xlu0 %456 }
  0x95   : > { %v459_v14 = vunpack.i.h.bf16 %v457_v13  ;;  %v458_v15 = vunpack.i.l.bf16 %v457_v13 }
  0x96   : > { %v238_v20 = vpop.f32.mrf.mxu1 }
  0x97   : > { %v183_v18 = vsel %vm182_vm2, %v458_v15, %v459_v14 }
  0x98   : > { %207 = vmatpush.msra.mxu0 %v183_v18  ;;  %405 = vmatpush.msra.mxu3 %v183_v18 }
  0x99   : > { %390 = vmatmul.msk.f32.vlgmr.msra.gmra.mxu0 %vm185_vm0, %v388_v16  ;;  %391 = vmatmul.msk.f32.vlgmr.msra.gmra.mxu3 %vm185_vm0, %v389_v17 }
  0x9a   : > { %397 = vmatmul.msk.f32.gmra.mxu2 %vm185_vm0, %v395_v19 }
  0x9e   : > { %v241_v26 = vpop.f32.mrf.mxu1 }
 0x114   : > { %v277_v21 = vpop.f32.mrf.mxu2 }
 0x116   : > { %v209_v23 = vpop.f32.mrf.mxu0 }
 0x117   : > { %v239_v24 = vadd.f32 %v238_v20, %v209_v23 }
 0x119   : > { %v283_v25 = vadd.f32 %v277_v21, %v239_v24 }
 0x11b   : > { %v297_v27 = vadd.f32 %v290_v22, %v283_v25 }
 0x11c   : > { %v212_v28 = vpop.f32.mrf.mxu3 }
 0x11d   : > { %v299_v29 = vmax.f32 %v297_v27, 0.0  ;;  %v242_v30 = vadd.f32 %v241_v26, %v212_v28  ;;  %v280_v31 = vpop.f32.mrf.mxu2 }
 0x11f   : > { %301 = vst [vmem:[%s163_s8] sm:$0xff] %v299_v29  ;;  %v284_v32 = vadd.f32 %v280_v31, %v242_v30 }
 0x121   : > { %v298_v34 = vadd.f32 %v295_v33, %v284_v32 }
 0x123   : > { %v300_v35 = vmax.f32 %v298_v34, 0.0 }
 0x125   : > { %302 = vst [vmem:[%s163_s8 + $0x8] sm:$0xff] %v300_v35 }
 0x126   : > { %489 = shalt.err (!%p486_p3)
}
 0x127   : > { %s529_s27 = smov 128   ;;  %s530_s28 = smov 8  }
 0x128   : > { %406 = dma.vmem_to_hbm [thread:$0]  (%p589_p5), %s317_s9, 256, %s319_s10, %s304_s16, %s529_s27, %s529_s27, %s530_s28  }
 0x129 PF: > { %p412_p4 = scmp.ge.s32.totalorder %s524_s15, 2  ;;  %s333_s29 = sand.u32 1, %s512_s12  }
 0x12a   : > { %s334_s30 = scalar_lea.sflag [#allocation3], %s333_s29 }
 0x12b   : > { %p409_p7 = pnand %p412_p4, %p593_p6 }
 0x12d   : > { %p410_p8 = pneg %p409_p7 }
 0x12f   : > { %507 = dma.done.wait (%p410_p8), %s334_s30, 256  }
 0x130   : > { %509 = vsyncadd (%p410_p8), %s334_s30, 4294967040  ;;  %p13_p9 = scmp.ge.s32.totalorder %s576_s18, 6   ;;  %s672_s12 = smov %s516_s13 }
 0x131   : > { %s673_s13 = smov %s520_s14  ;;  %s674_s14 = smov %s587_s21 }
 0x132   : > { %s675_s15 = smov %s576_s18  ;;  %15 = sbr.rel (!%p13_p9) target bundleno = 3 (0x3), region = 69 }
 0x137   :  { %340 = vsyncpa [#allocation3], 1 }
 0x138   :  { %342 = vsyncpa [#allocation3 + $0x1], 1 }

</bundles_post_ra>
